<compile_context>
chip_gen: v6e
topology: v6e:2x2x1
jax: 0.10.0
libtpu: 0.0.40
codegen_flags: <defaults>
</compile_context>

<pallas_src>
import functools

import jax
import jax.numpy as jnp
from jax import lax
from jax.experimental import pallas as pl
from jax.experimental.pallas import tpu as pltpu


def _pick_row_tile(h_out, w_out):
    """Pick TH output rows per grid step such that TH | H_out and the flattened
    output block TH*W_out is a multiple of 128 lanes (legal BlockSpec, unmasked
    stores).  Falls back to the full extent when no such divisor exists."""
    valid = [th for th in range(1, h_out + 1)
             if h_out % th == 0 and (th * w_out) % 128 == 0]
    if not valid:
        return h_out
    big_enough = [th for th in valid if th >= 8]
    return min(big_enough) if big_enough else max(valid)


def _atrous_sep_conv_kernel(x_ref, dww_ref, pww_ref, b_ref, o_ref, acc_ref,
                            *, K, stride, dilation, TH, W_out):
    """Grid = (batch, output-row tile).

    x_ref:   (1, Cin, Hp, Wp)      full padded image for this batch element
    dww_ref: (Cin*TH, K*K)         depthwise weights, each channel repeated TH x
    pww_ref: (Cout, Cin)           pointwise (1x1 conv) weights
    b_ref:   (Cout, 1)             fused bias = pw_w @ dw_bias + pw_bias
    o_ref:   (1, Cout, TH*W_out)   flattened output rows for this tile
    acc_ref: (Cin, TH*W_out) f32   scratch used to flatten rows into lanes
    """
    t = pl.program_id(1)
    cin = x_ref.shape[1]
    # First input row touched by this tile (aligned hint helps sublane loads).
    row0 = pl.multiple_of(t * (TH * stride), TH * stride)

    dw_w = dww_ref[...].astype(jnp.float32)        # (Cin*TH, K*K), loaded once

    # ---- depthwise atrous convolution: K*K shifted windows read directly from
    # the pipelined VMEM buffer, accumulated in f32 on the VPU. ----
    acc = jnp.zeros((cin * TH, W_out), jnp.float32)
    h_span = (TH - 1) * stride + 1
    w_span = (W_out - 1) * stride + 1
    for kh in range(K):
        for kw in range(K):
            if stride == 1:
                patch = x_ref[0, :, pl.ds(row0 + kh * dilation, TH),
                              pl.ds(kw * dilation, W_out)]
            else:
                win = x_ref[0, :, pl.ds(row0 + kh * dilation, h_span),
                            pl.ds(kw * dilation, w_span)]
                patch = lax.slice(win, (0, 0, 0), win.shape, (1, stride, stride))
            patch = patch.astype(jnp.float32).reshape(cin * TH, W_out)
            k_idx = kh * K + kw
            # (Cin*TH, 1) column broadcast over lanes -> per-channel scalar MAC.
            acc = acc + patch * dw_w[:, k_idx:k_idx + 1]

    # ---- flatten (Cin, TH, W_out) -> (Cin, TH*W_out) through VMEM scratch so
    # the pointwise matmul and the output store are lane dense. ----
    acc3 = acc.reshape(cin, TH, W_out)
    for r in range(TH):
        acc_ref[:, pl.ds(r * W_out, W_out)] = acc3[:, r, :]

    # ---- pointwise 1x1 conv: (Cout, Cin) x (Cin, TH*W_out) on the MXU, with a
    # single fused bias add in the epilogue. ----
    out = jnp.dot(pww_ref[...].astype(jnp.float32), acc_ref[...],
                  preferred_element_type=jnp.float32)
    out = out + b_ref[...].astype(jnp.float32)
    o_ref[0] = out.astype(o_ref.dtype)


def atrous_separable_conv(x_nchw, dw_weight, dw_bias, pw_weight, pw_bias,
                          *, stride=1, padding=0, dilation=1):
    """Forward pass matching the PyTorch AtrousSeparableConvolution.

    x_nchw:    (N, Cin, H, W)
    dw_weight: (Cin, 1, K, K)     torch depthwise conv weight layout
    dw_bias:   (Cin,)
    pw_weight: (Cout, Cin, 1, 1)  torch 1x1 conv weight layout
    pw_bias:   (Cout,)
    returns    (N, Cout, H_out, W_out)
    """
    N, Cin, H, W = x_nchw.shape
    Cout = pw_weight.shape[0]
    K = dw_weight.shape[-1]

    H_out = (H + 2 * padding - dilation * (K - 1) - 1) // stride + 1
    W_out = (W + 2 * padding - dilation * (K - 1) - 1) // stride + 1

    TH = _pick_row_tile(H_out, W_out)
    T = H_out // TH

    # Glue (plain XLA): spatial zero padding only -- no layout transposes.
    x_pad = jnp.pad(x_nchw, ((0, 0), (0, 0),
                             (padding, padding), (padding, padding)))
    Hp, Wp = x_pad.shape[2], x_pad.shape[3]

    # Depthwise weights (Cin, 1, K, K) -> (Cin*TH, K*K): each channel's row is
    # repeated TH times so it broadcasts against the collapsed (Cin*TH, W_out)
    # patch layout with a plain column broadcast.
    dw_w2 = dw_weight[:, 0, :, :].reshape(Cin, K * K).astype(jnp.float32)
    dw_rep = jnp.repeat(dw_w2, TH, axis=0)

    pw_w2 = pw_weight[:, :, 0, 0].astype(jnp.float32)               # (Cout, Cin)
    # Fold the depthwise bias through the (linear) 1x1 conv -> one bias add.
    fused_b = (pw_w2 @ dw_bias.astype(jnp.float32)
               + pw_bias.astype(jnp.float32)).reshape(Cout, 1)

    kernel = functools.partial(
        _atrous_sep_conv_kernel,
        K=K, stride=stride, dilation=dilation, TH=TH, W_out=W_out)

    out_flat = pl.pallas_call(
        kernel,
        out_shape=jax.ShapeDtypeStruct((N, Cout, H_out * W_out), x_nchw.dtype),
        grid_spec=pltpu.PrefetchScalarGridSpec(
            num_scalar_prefetch=0,
            grid=(N, T),
            in_specs=[
                # Full padded image per batch element; index map is constant in
                # the row-tile axis so the block is DMA'd only when n changes,
                # and the overlapping row halo is taken by in-kernel slicing.
                # TODO(synk): for very large images, replace with a manual
                # double-buffered halo DMA (memory_space=pl.ANY) to bound VMEM.
                pl.BlockSpec((1, Cin, Hp, Wp), lambda n, t: (n, 0, 0, 0)),
                # Weights / bias: constant index maps -> fetched once.
                pl.BlockSpec((Cin * TH, K * K), lambda n, t: (0, 0)),
                pl.BlockSpec((Cout, Cin), lambda n, t: (0, 0)),
                pl.BlockSpec((Cout, 1), lambda n, t: (0, 0)),
            ],
            # Lane-dense output block: last dim TH*W_out is a multiple of 128
            # (or the full extent in the fallback case).
            out_specs=pl.BlockSpec((1, Cout, TH * W_out), lambda n, t: (n, 0, t)),
            scratch_shapes=[pltpu.VMEM((Cin, TH * W_out), jnp.float32)],
        ),
        compiler_params=pltpu.CompilerParams(
            # Both axes independent -> megacore / v7x dual-TC sharding.
            dimension_semantics=("parallel", "parallel"),
            # Explicit budget (fits v7x 64 MiB, raises v5e/v6e scoped defaults).
            vmem_limit_bytes=64 * 1024 * 1024,
        ),
    )(x_pad, dw_rep, pw_w2, fused_b)

    return out_flat.reshape(N, Cout, H_out, W_out)


def _reference(x_nchw, dw_weight, dw_bias, pw_weight, pw_bias,
               *, stride, padding, dilation):
    """Pure-JAX reference using lax.conv_general_dilated (matches torch Conv2d)."""
    Cin = x_nchw.shape[1]
    y = lax.conv_general_dilated(
        x_nchw, dw_weight,
        window_strides=(stride, stride),
        padding=((padding, padding), (padding, padding)),
        rhs_dilation=(dilation, dilation),
        dimension_numbers=("NCHW", "OIHW", "NCHW"),
        feature_group_count=Cin,
    ) + dw_bias[None, :, None, None]
    z = lax.conv_general_dilated(
        y, pw_weight,
        window_strides=(1, 1),
        padding=((0, 0), (0, 0)),
        dimension_numbers=("NCHW", "OIHW", "NCHW"),
    ) + pw_bias[None, :, None, None]
    return z


if __name__ == "__main__":
    # Module hyperparameters (small, consistent with the forward pass).
    in_channels, out_channels = 8, 16
    kernel_size, stride, padding, dilation = 3, 1, 2, 2
    N, H, W = 2, 16, 16

    key = jax.random.PRNGKey(0)
    kx, k1, k2, k3, k4 = jax.random.split(key, 5)

    x = jax.random.normal(kx, (N, in_channels, H, W), jnp.float32)

    # Deterministic kaiming-normal-style init (shapes from nn.Conv2d in __init__).
    fan_dw = 1 * kernel_size * kernel_size
    dw_weight = jax.random.normal(
        k1, (in_channels, 1, kernel_size, kernel_size), jnp.float32
    ) * jnp.sqrt(2.0 / fan_dw)
    dw_bias = jax.random.normal(k2, (in_channels,), jnp.float32) * 0.1

    fan_pw = in_channels
    pw_weight = jax.random.normal(
        k3, (out_channels, in_channels, 1, 1), jnp.float32
    ) * jnp.sqrt(2.0 / fan_pw)
    pw_bias = jax.random.normal(k4, (out_channels,), jnp.float32) * 0.1

    out = atrous_separable_conv(
        x, dw_weight, dw_bias, pw_weight, pw_bias,
        stride=stride, padding=padding, dilation=dilation,
    )
    out = jax.block_until_ready(out)

    ref = _reference(
        x, dw_weight, dw_bias, pw_weight, pw_bias,
        stride=stride, padding=padding, dilation=dilation,
    )
    assert out.shape == ref.shape, (out.shape, ref.shape)
    assert jnp.allclose(out, ref, atol=1e-4, rtol=1e-4), float(
        jnp.max(jnp.abs(out - ref))
    )
    print("KERNEL_OK")
</pallas_src>

<mosaic_0001>
module attributes {stable_mosaic.version = 11 : i64} {
  func.func @_atrous_sep_conv_kernel(%arg0: i32, %arg1: i32, %arg2: memref<1x8x20x20xf32, #tpu.memory_space<vmem>>, %arg3: memref<64x9xf32, #tpu.memory_space<vmem>>, %arg4: memref<16x8xf32, #tpu.memory_space<vmem>>, %arg5: memref<16x1xf32, #tpu.memory_space<vmem>>, %arg6: memref<1x16x128xf32, #tpu.memory_space<vmem>>, %arg7: memref<8x128xf32, #tpu.memory_space<vmem>>) attributes {dimension_semantics = [#tpu.dimension_semantics<parallel>, #tpu.dimension_semantics<parallel>], iteration_bounds = array<i64: 2, 2>, scalar_prefetch = 0 : i64, scratch_operands = 1 : i64, tpu.core_type = #tpu.core_type<tc>, window_params = [{transform_indices = @transform_0, window_bounds = array<i64: 1, 8, 20, 20>}, {pipeline_mode = #tpu.pipeline_mode<synchronous>, transform_indices = @transform_1, window_bounds = array<i64: 64, 9>}, {pipeline_mode = #tpu.pipeline_mode<synchronous>, transform_indices = @transform_2, window_bounds = array<i64: 16, 8>}, {pipeline_mode = #tpu.pipeline_mode<synchronous>, transform_indices = @transform_3, window_bounds = array<i64: 16, 1>}, {transform_indices = @transform_4, window_bounds = array<i64: 1, 16, 128>}]} {
    %c8_i32 = arith.constant 8 : i32
    %0 = arith.muli %arg1, %c8_i32 : i32
    %1 = tpu.assume_multiple %0, 8 : i32
    %c0 = arith.constant 0 : index
    %c0_0 = arith.constant 0 : index
    %2 = vector.load %arg3[%c0, %c0_0] : memref<64x9xf32, #tpu.memory_space<vmem>>, vector<64x9xf32>
    %cst = arith.constant 0.000000e+00 : f32
    %3 = vector.broadcast %cst : f32 to vector<64x16xf32>
    %c0_i32 = arith.constant 0 : i32
    %4 = arith.addi %1, %c0_i32 : i32
    %c0_1 = arith.constant 0 : index
    %c0_2 = arith.constant 0 : index
    %5 = arith.index_cast %4 : i32 to index
    %c0_3 = arith.constant 0 : index
    %6 = vector.load %arg2[%c0_1, %c0_2, %5, %c0_3] : memref<1x8x20x20xf32, #tpu.memory_space<vmem>>, vector<1x8x8x16xf32>
    %7 = vector.shape_cast %6 : vector<1x8x8x16xf32> to vector<8x8x16xf32>
    %8 = vector.shape_cast %7 : vector<8x8x16xf32> to vector<64x16xf32>
    %9 = vector.extract_strided_slice %2 {offsets = [0, 0], sizes = [64, 1], strides = [1, 1]} : vector<64x9xf32> to vector<64x1xf32>
    %10 = vector.broadcast %9 : vector<64x1xf32> to vector<64x16xf32>
    %11 = arith.mulf %8, %10 : vector<64x16xf32>
    %12 = arith.addf %3, %11 : vector<64x16xf32>
    %c0_i32_4 = arith.constant 0 : i32
    %13 = arith.addi %1, %c0_i32_4 : i32
    %c0_5 = arith.constant 0 : index
    %c0_6 = arith.constant 0 : index
    %14 = arith.index_cast %13 : i32 to index
    %c2 = arith.constant 2 : index
    %15 = vector.load %arg2[%c0_5, %c0_6, %14, %c2] : memref<1x8x20x20xf32, #tpu.memory_space<vmem>>, vector<1x8x8x16xf32>
    %16 = vector.shape_cast %15 : vector<1x8x8x16xf32> to vector<8x8x16xf32>
    %17 = vector.shape_cast %16 : vector<8x8x16xf32> to vector<64x16xf32>
    %18 = vector.extract_strided_slice %2 {offsets = [0, 1], sizes = [64, 1], strides = [1, 1]} : vector<64x9xf32> to vector<64x1xf32>
    %19 = vector.broadcast %18 : vector<64x1xf32> to vector<64x16xf32>
    %20 = arith.mulf %17, %19 : vector<64x16xf32>
    %21 = arith.addf %12, %20 : vector<64x16xf32>
    %c0_i32_7 = arith.constant 0 : i32
    %22 = arith.addi %1, %c0_i32_7 : i32
    %c0_8 = arith.constant 0 : index
    %c0_9 = arith.constant 0 : index
    %23 = arith.index_cast %22 : i32 to index
    %c4 = arith.constant 4 : index
    %24 = vector.load %arg2[%c0_8, %c0_9, %23, %c4] : memref<1x8x20x20xf32, #tpu.memory_space<vmem>>, vector<1x8x8x16xf32>
    %25 = vector.shape_cast %24 : vector<1x8x8x16xf32> to vector<8x8x16xf32>
    %26 = vector.shape_cast %25 : vector<8x8x16xf32> to vector<64x16xf32>
    %27 = vector.extract_strided_slice %2 {offsets = [0, 2], sizes = [64, 1], strides = [1, 1]} : vector<64x9xf32> to vector<64x1xf32>
    %28 = vector.broadcast %27 : vector<64x1xf32> to vector<64x16xf32>
    %29 = arith.mulf %26, %28 : vector<64x16xf32>
    %30 = arith.addf %21, %29 : vector<64x16xf32>
    %c2_i32 = arith.constant 2 : i32
    %31 = arith.addi %1, %c2_i32 : i32
    %c0_10 = arith.constant 0 : index
    %c0_11 = arith.constant 0 : index
    %32 = arith.index_cast %31 : i32 to index
    %c0_12 = arith.constant 0 : index
    %33 = vector.load %arg2[%c0_10, %c0_11, %32, %c0_12] : memref<1x8x20x20xf32, #tpu.memory_space<vmem>>, vector<1x8x8x16xf32>
    %34 = vector.shape_cast %33 : vector<1x8x8x16xf32> to vector<8x8x16xf32>
    %35 = vector.shape_cast %34 : vector<8x8x16xf32> to vector<64x16xf32>
    %36 = vector.extract_strided_slice %2 {offsets = [0, 3], sizes = [64, 1], strides = [1, 1]} : vector<64x9xf32> to vector<64x1xf32>
    %37 = vector.broadcast %36 : vector<64x1xf32> to vector<64x16xf32>
    %38 = arith.mulf %35, %37 : vector<64x16xf32>
    %39 = arith.addf %30, %38 : vector<64x16xf32>
    %c2_i32_13 = arith.constant 2 : i32
    %40 = arith.addi %1, %c2_i32_13 : i32
    %c0_14 = arith.constant 0 : index
    %c0_15 = arith.constant 0 : index
    %41 = arith.index_cast %40 : i32 to index
    %c2_16 = arith.constant 2 : index
    %42 = vector.load %arg2[%c0_14, %c0_15, %41, %c2_16] : memref<1x8x20x20xf32, #tpu.memory_space<vmem>>, vector<1x8x8x16xf32>
    %43 = vector.shape_cast %42 : vector<1x8x8x16xf32> to vector<8x8x16xf32>
    %44 = vector.shape_cast %43 : vector<8x8x16xf32> to vector<64x16xf32>
    %45 = vector.extract_strided_slice %2 {offsets = [0, 4], sizes = [64, 1], strides = [1, 1]} : vector<64x9xf32> to vector<64x1xf32>
    %46 = vector.broadcast %45 : vector<64x1xf32> to vector<64x16xf32>
    %47 = arith.mulf %44, %46 : vector<64x16xf32>
    %48 = arith.addf %39, %47 : vector<64x16xf32>
    %c2_i32_17 = arith.constant 2 : i32
    %49 = arith.addi %1, %c2_i32_17 : i32
    %c0_18 = arith.constant 0 : index
    %c0_19 = arith.constant 0 : index
    %50 = arith.index_cast %49 : i32 to index
    %c4_20 = arith.constant 4 : index
    %51 = vector.load %arg2[%c0_18, %c0_19, %50, %c4_20] : memref<1x8x20x20xf32, #tpu.memory_space<vmem>>, vector<1x8x8x16xf32>
    %52 = vector.shape_cast %51 : vector<1x8x8x16xf32> to vector<8x8x16xf32>
    %53 = vector.shape_cast %52 : vector<8x8x16xf32> to vector<64x16xf32>
    %54 = vector.extract_strided_slice %2 {offsets = [0, 5], sizes = [64, 1], strides = [1, 1]} : vector<64x9xf32> to vector<64x1xf32>
    %55 = vector.broadcast %54 : vector<64x1xf32> to vector<64x16xf32>
    %56 = arith.mulf %53, %55 : vector<64x16xf32>
    %57 = arith.addf %48, %56 : vector<64x16xf32>
    %c4_i32 = arith.constant 4 : i32
    %58 = arith.addi %1, %c4_i32 : i32
    %c0_21 = arith.constant 0 : index
    %c0_22 = arith.constant 0 : index
    %59 = arith.index_cast %58 : i32 to index
    %c0_23 = arith.constant 0 : index
    %60 = vector.load %arg2[%c0_21, %c0_22, %59, %c0_23] : memref<1x8x20x20xf32, #tpu.memory_space<vmem>>, vector<1x8x8x16xf32>
    %61 = vector.shape_cast %60 : vector<1x8x8x16xf32> to vector<8x8x16xf32>
    %62 = vector.shape_cast %61 : vector<8x8x16xf32> to vector<64x16xf32>
    %63 = vector.extract_strided_slice %2 {offsets = [0, 6], sizes = [64, 1], strides = [1, 1]} : vector<64x9xf32> to vector<64x1xf32>
    %64 = vector.broadcast %63 : vector<64x1xf32> to vector<64x16xf32>
    %65 = arith.mulf %62, %64 : vector<64x16xf32>
    %66 = arith.addf %57, %65 : vector<64x16xf32>
    %c4_i32_24 = arith.constant 4 : i32
    %67 = arith.addi %1, %c4_i32_24 : i32
    %c0_25 = arith.constant 0 : index
    %c0_26 = arith.constant 0 : index
    %68 = arith.index_cast %67 : i32 to index
    %c2_27 = arith.constant 2 : index
    %69 = vector.load %arg2[%c0_25, %c0_26, %68, %c2_27] : memref<1x8x20x20xf32, #tpu.memory_space<vmem>>, vector<1x8x8x16xf32>
    %70 = vector.shape_cast %69 : vector<1x8x8x16xf32> to vector<8x8x16xf32>
    %71 = vector.shape_cast %70 : vector<8x8x16xf32> to vector<64x16xf32>
    %72 = vector.extract_strided_slice %2 {offsets = [0, 7], sizes = [64, 1], strides = [1, 1]} : vector<64x9xf32> to vector<64x1xf32>
    %73 = vector.broadcast %72 : vector<64x1xf32> to vector<64x16xf32>
    %74 = arith.mulf %71, %73 : vector<64x16xf32>
    %75 = arith.addf %66, %74 : vector<64x16xf32>
    %c4_i32_28 = arith.constant 4 : i32
    %76 = arith.addi %1, %c4_i32_28 : i32
    %c0_29 = arith.constant 0 : index
    %c0_30 = arith.constant 0 : index
    %77 = arith.index_cast %76 : i32 to index
    %c4_31 = arith.constant 4 : index
    %78 = vector.load %arg2[%c0_29, %c0_30, %77, %c4_31] : memref<1x8x20x20xf32, #tpu.memory_space<vmem>>, vector<1x8x8x16xf32>
    %79 = vector.shape_cast %78 : vector<1x8x8x16xf32> to vector<8x8x16xf32>
    %80 = vector.shape_cast %79 : vector<8x8x16xf32> to vector<64x16xf32>
    %81 = vector.extract_strided_slice %2 {offsets = [0, 8], sizes = [64, 1], strides = [1, 1]} : vector<64x9xf32> to vector<64x1xf32>
    %82 = vector.broadcast %81 : vector<64x1xf32> to vector<64x16xf32>
    %83 = arith.mulf %80, %82 : vector<64x16xf32>
    %84 = arith.addf %75, %83 : vector<64x16xf32>
    %85 = vector.shape_cast %84 : vector<64x16xf32> to vector<8x8x16xf32>
    %86 = vector.extract_strided_slice %85 {offsets = [0, 0, 0], sizes = [8, 1, 16], strides = [1, 1, 1]} : vector<8x8x16xf32> to vector<8x1x16xf32>
    %87 = vector.shape_cast %86 : vector<8x1x16xf32> to vector<8x16xf32>
    %c0_32 = arith.constant 0 : index
    %c0_33 = arith.constant 0 : index
    %88 = vector.load %arg7[%c0_32, %c0_33] : memref<8x128xf32, #tpu.memory_space<vmem>>, vector<8x16xf32>
    tpu.vector_store %arg7[%c0_32, %c0_33], %87 {strides = array<i32>} : memref<8x128xf32, #tpu.memory_space<vmem>>, vector<8x16xf32>,
    %89 = vector.extract_strided_slice %85 {offsets = [0, 1, 0], sizes = [8, 1, 16], strides = [1, 1, 1]} : vector<8x8x16xf32> to vector<8x1x16xf32>
    %90 = vector.shape_cast %89 : vector<8x1x16xf32> to vector<8x16xf32>
    %c0_34 = arith.constant 0 : index
    %c16 = arith.constant 16 : index
    %91 = vector.load %arg7[%c0_34, %c16] : memref<8x128xf32, #tpu.memory_space<vmem>>, vector<8x16xf32>
    tpu.vector_store %arg7[%c0_34, %c16], %90 {strides = array<i32>} : memref<8x128xf32, #tpu.memory_space<vmem>>, vector<8x16xf32>,
    %92 = vector.extract_strided_slice %85 {offsets = [0, 2, 0], sizes = [8, 1, 16], strides = [1, 1, 1]} : vector<8x8x16xf32> to vector<8x1x16xf32>
    %93 = vector.shape_cast %92 : vector<8x1x16xf32> to vector<8x16xf32>
    %c0_35 = arith.constant 0 : index
    %c32 = arith.constant 32 : index
    %94 = vector.load %arg7[%c0_35, %c32] : memref<8x128xf32, #tpu.memory_space<vmem>>, vector<8x16xf32>
    tpu.vector_store %arg7[%c0_35, %c32], %93 {strides = array<i32>} : memref<8x128xf32, #tpu.memory_space<vmem>>, vector<8x16xf32>,
    %95 = vector.extract_strided_slice %85 {offsets = [0, 3, 0], sizes = [8, 1, 16], strides = [1, 1, 1]} : vector<8x8x16xf32> to vector<8x1x16xf32>
    %96 = vector.shape_cast %95 : vector<8x1x16xf32> to vector<8x16xf32>
    %c0_36 = arith.constant 0 : index
    %c48 = arith.constant 48 : index
    %97 = vector.load %arg7[%c0_36, %c48] : memref<8x128xf32, #tpu.memory_space<vmem>>, vector<8x16xf32>
    tpu.vector_store %arg7[%c0_36, %c48], %96 {strides = array<i32>} : memref<8x128xf32, #tpu.memory_space<vmem>>, vector<8x16xf32>,
    %98 = vector.extract_strided_slice %85 {offsets = [0, 4, 0], sizes = [8, 1, 16], strides = [1, 1, 1]} : vector<8x8x16xf32> to vector<8x1x16xf32>
    %99 = vector.shape_cast %98 : vector<8x1x16xf32> to vector<8x16xf32>
    %c0_37 = arith.constant 0 : index
    %c64 = arith.constant 64 : index
    %100 = vector.load %arg7[%c0_37, %c64] : memref<8x128xf32, #tpu.memory_space<vmem>>, vector<8x16xf32>
    tpu.vector_store %arg7[%c0_37, %c64], %99 {strides = array<i32>} : memref<8x128xf32, #tpu.memory_space<vmem>>, vector<8x16xf32>,
    %101 = vector.extract_strided_slice %85 {offsets = [0, 5, 0], sizes = [8, 1, 16], strides = [1, 1, 1]} : vector<8x8x16xf32> to vector<8x1x16xf32>
    %102 = vector.shape_cast %101 : vector<8x1x16xf32> to vector<8x16xf32>
    %c0_38 = arith.constant 0 : index
    %c80 = arith.constant 80 : index
    %103 = vector.load %arg7[%c0_38, %c80] : memref<8x128xf32, #tpu.memory_space<vmem>>, vector<8x16xf32>
    tpu.vector_store %arg7[%c0_38, %c80], %102 {strides = array<i32>} : memref<8x128xf32, #tpu.memory_space<vmem>>, vector<8x16xf32>,
    %104 = vector.extract_strided_slice %85 {offsets = [0, 6, 0], sizes = [8, 1, 16], strides = [1, 1, 1]} : vector<8x8x16xf32> to vector<8x1x16xf32>
    %105 = vector.shape_cast %104 : vector<8x1x16xf32> to vector<8x16xf32>
    %c0_39 = arith.constant 0 : index
    %c96 = arith.constant 96 : index
    %106 = vector.load %arg7[%c0_39, %c96] : memref<8x128xf32, #tpu.memory_space<vmem>>, vector<8x16xf32>
    tpu.vector_store %arg7[%c0_39, %c96], %105 {strides = array<i32>} : memref<8x128xf32, #tpu.memory_space<vmem>>, vector<8x16xf32>,
    %107 = vector.extract_strided_slice %85 {offsets = [0, 7, 0], sizes = [8, 1, 16], strides = [1, 1, 1]} : vector<8x8x16xf32> to vector<8x1x16xf32>
    %108 = vector.shape_cast %107 : vector<8x1x16xf32> to vector<8x16xf32>
    %c0_40 = arith.constant 0 : index
    %c112 = arith.constant 112 : index
    %109 = vector.load %arg7[%c0_40, %c112] : memref<8x128xf32, #tpu.memory_space<vmem>>, vector<8x16xf32>
    tpu.vector_store %arg7[%c0_40, %c112], %108 {strides = array<i32>} : memref<8x128xf32, #tpu.memory_space<vmem>>, vector<8x16xf32>,
    %c0_41 = arith.constant 0 : index
    %c0_42 = arith.constant 0 : index
    %110 = vector.load %arg4[%c0_41, %c0_42] : memref<16x8xf32, #tpu.memory_space<vmem>>, vector<16x8xf32>
    %c0_43 = arith.constant 0 : index
    %c0_44 = arith.constant 0 : index
    %111 = vector.load %arg7[%c0_43, %c0_44] : memref<8x128xf32, #tpu.memory_space<vmem>>, vector<8x128xf32>
    %cst_45 = arith.constant dense<0.000000e+00> : vector<16x128xf32>
    %112 = tpu.matmul %110, %111, %cst_45 {dimension_numbers = #tpu.dot_dimension_numbers<[1], [0], [0], [1], [0, 0, 1, 1], [], []>} : vector<16x8xf32>, vector<8x128xf32>, vector<16x128xf32> -> vector<16x128xf32>
    %c0_46 = arith.constant 0 : index
    %c0_47 = arith.constant 0 : index
    %113 = vector.load %arg5[%c0_46, %c0_47] : memref<16x1xf32, #tpu.memory_space<vmem>>, vector<16x1xf32>
    %114 = vector.broadcast %113 : vector<16x1xf32> to vector<16x128xf32>
    %115 = arith.addf %112, %114 : vector<16x128xf32>
    %c0_48 = arith.constant 0 : index
    %c0_49 = arith.constant 0 : index
    %c0_50 = arith.constant 0 : index
    %116 = vector.load %arg6[%c0_48, %c0_49, %c0_50] : memref<1x16x128xf32, #tpu.memory_space<vmem>>, vector<1x16x128xf32>
    %117 = vector.shape_cast %116 : vector<1x16x128xf32> to vector<16x128xf32>
    %118 = vector.shape_cast %115 : vector<16x128xf32> to vector<1x16x128xf32>
    tpu.vector_store %arg6[%c0_48, %c0_49, %c0_50], %118 {strides = array<i32>} : memref<1x16x128xf32, #tpu.memory_space<vmem>>, vector<1x16x128xf32>,
    return
  }
  func.func @transform_0(%arg0: i32, %arg1: i32) -> (i32, i32, i32, i32) {
    %c0_i32 = arith.constant 0 : i32
    %c0_i32_0 = arith.constant 0 : i32
    %c0_i32_1 = arith.constant 0 : i32
    %c0_i32_2 = arith.constant 0 : i32
    return %arg0, %c0_i32, %c0_i32_0, %c0_i32_1 : i32, i32, i32, i32
  }
  func.func @transform_1(%arg0: i32, %arg1: i32) -> (i32, i32) {
    %c0_i32 = arith.constant 0 : i32
    %c0_i32_0 = arith.constant 0 : i32
    %c0_i32_1 = arith.constant 0 : i32
    return %c0_i32, %c0_i32_0 : i32, i32
  }
  func.func @transform_2(%arg0: i32, %arg1: i32) -> (i32, i32) {
    %c0_i32 = arith.constant 0 : i32
    %c0_i32_0 = arith.constant 0 : i32
    %c0_i32_1 = arith.constant 0 : i32
    return %c0_i32, %c0_i32_0 : i32, i32
  }
  func.func @transform_3(%arg0: i32, %arg1: i32) -> (i32, i32) {
    %c0_i32 = arith.constant 0 : i32
    %c0_i32_0 = arith.constant 0 : i32
    %c0_i32_1 = arith.constant 0 : i32
    return %c0_i32, %c0_i32_0 : i32, i32
  }
  func.func @transform_4(%arg0: i32, %arg1: i32) -> (i32, i32, i32) {
    %c0_i32 = arith.constant 0 : i32
    %c0_i32_0 = arith.constant 0 : i32
    return %arg0, %c0_i32, %arg1 : i32, i32, i32
  }
}

</mosaic_0001>

<bundles_post_ra>
// kernel: tpu_custom_call.1
= control target key start
LH: loop header
LB: loop body
LE: loop exit
PB: predicated region body
PF: predicated region fallthrough
CT: control target
= control target key end

     0   :  { %9 = vsyncpa [#allocation4], 0  ;;  %s2117_s0 = inlined_call_operand.vmem [shape: f32[2,8,20,20], index: 0, kind: input, shape index: {}]   ;;  %s2118_s1 = inlined_call_operand.vmem [shape: f32[64,9], index: 1, kind: input, shape index: {}]   ;;  %s2119_s2 = inlined_call_operand.vmem [shape: f32[16,8], index: 2, kind: input, shape index: {}]   ;;  %s2120_s3 = inlined_call_operand.vmem [shape: f32[16,1], index: 3, kind: input, shape index: {}]   ;;  %s2121_s4 = inlined_call_operand.hbm [shape: f32[2,16,256], index: 4, kind: output, shape index: {}]  }
   0x1   :  { %11 = vsyncpa [#allocation4 + $0x1], 0  ;;  %s1515_s15 = smov 0   ;;  %s1517_s16 = smov 0  }
   0x2   :  { %s1519_s17 = smov 0   ;;  %s1521_s18 = smov 0  }
   0x3   :  { %s1523_s19 = smov 0   ;;  %s1525_s20 = smov 0  }
   0x4   :  { %s1527_s21 = smov 0   ;;  %s1529_s22 = smov 0  }
   0x5 LB: > { %s1221_s23 = sadd.s32 4294967295, %s1466_s22   ;;  %s1222_s24 = sadd.s32 4294967294, %s1466_s22   ;;  %s1466_s22 = sphi %s1529_s22, %s17_s22   ;;  %s1462_s21 = sphi %s1527_s21, %s2130_s21   ;;  %s1458_s20 = sphi %s1525_s20, %s2129_s20   ;;  %s1454_s19 = sphi %s1523_s19, %s2128_s19   ;;  %s1450_s18 = sphi %s1521_s18, %s2127_s18   ;;  %s1446_s17 = sphi %s1519_s17, %s2126_s17   ;;  %s1442_s16 = sphi %s1517_s16, %s2125_s16   ;;  %s1438_s15 = sphi %s1515_s15, %s2124_s15  }
   0x6   : > { %s26_s25 = sadd.s32 1, %s1458_s20  ;;  %s29_s26 = sadd.s32 1, %s1462_s21 }
   0x7   : > { %p27_p0 = scmp.ge.s32.totalorder %s26_s25, 2  ;;  %p137_p1 = scmp.ne.s32.totalorder %s1446_s17, %s1442_s16 }
   0x8   : > { %p138_p2 = scmp.eq.s32.totalorder %s1221_s23, 3  ;;  %p143_p5 = scmp.ne.s32.totalorder %s1442_s16, %s1438_s15 }
   0x9   : > { %s2132_s25 = smov (%p27_p0, %s26_s25), 0  ;;  %s2134_s26 = smov (!%p27_p0, %s29_s26), %s1462_s21 }
   0xa   : > { %s123_s27 = ssub.s32 %s1458_s20, %s2132_s25  ;;  %p1566_p3 = por %p138_p2, %p137_p1 }
   0xb   : > { %p31_p4 = scmp.ge.s32.totalorder %s2134_s26, 2  ;;  %p144_p6 = scmp.eq.s32.totalorder %s1222_s24, 3 }
   0xc   : > { %p1225_p7 = scmp.ge.s32.totalorder %s1466_s22, 1  ;;  %p179_p9 = scmp.lt.s32.totalorder %s1466_s22, 5 }
   0xd   : > { %s2136_s26 = smov (%p31_p4, %s2134_s26), 0  ;;  %p1575_p8 = por %p144_p6, %p143_p5 }
   0xe   : > { %s122_s30 = ssub.s32 %s1462_s21, %s2136_s26  ;;  %s127_s5 = sadd.s32 1, %s1446_s17 }
   0xf   : > { %s124_s6 = sor.u32 %s123_s27, %s122_s30  ;;  %p180_p10 = pnand %p1225_p7, %p179_p9 }
  0x10   : > { %p125_p11 = scmp.eq.s32.totalorder %s124_s6, 0  ;;  %p205_p12 = scmp.lt.s32.totalorder (!%p180_p10), %s1454_s19, 1 }
  0x11   : > { %183 = sbr.rel (%p180_p10) target bundleno = 788 (0x314), region = 36  ;;  %s1228_s24 = sshll.u32 (!%p180_p10), %s1450_s18, 3 }
  0x12   : > { %s1584_s7 = scalar_select %p125_p11, %s1446_s17, %s127_s5  }
  0x13   : > { %s1476_s30 = smov (!%p180_p10), 126   ;;  %s1477_s5 = smov (!%p180_p10), 124  }
  0x14   : > { %s1479_s6 = smov (!%p180_p10), 16   ;;  %s1480_s8 = smov (!%p180_p10), 32  }
  0x15   : > { %s1481_s9 = smov (!%p180_p10), 48   ;;  %s1482_s10 = smov (!%p180_p10), 64  }
  0x16   : > { %v1589_v0 = vld [vmem:[%s2118_s1 + $0x8] sm:$0xff]  ;;  %v1594_v1 = vld [vmem:[%s2118_s1] sm:$0xff]  ;;  %v1468_v2 = vmov 1   ;;  %v1601_v3 = vld [vmem:[%s2118_s1 + $0x10] sm:$0xff]  ;;  %v1469_v8 = vmov 2   ;;  %v1470_v10 = vmov 4  }
  0x17   : > { %1356 = vset.pattern.permute.xlu1 %v1468_v2  ;;  %1355 = vset.pattern.permute.xlu0 %v1468_v2  ;;  %v1606_v4 = vld [vmem:[%s2118_s1 + $0x18] sm:$0xff]  ;;  %v1613_v5 = vld [vmem:[%s2118_s1 + $0x28] sm:$0xff]  ;;  %v1618_v6 = vld [vmem:[%s2118_s1 + $0x20] sm:$0xff]  ;;  %v1471_v11 = vmov 5   ;;  %v1472_v12 = vmov 7   ;;  %v1473_v13 = vmov 8  }
  0x18   : > { %289 = vperm.xlu0 %1355, %v1589_v0   ;;  %285 = vperm.xlu1 %1356, %v1594_v1   ;;  %v1625_v7 = vld [vmem:[%s2118_s1 + $0x30] sm:$0xff]  ;;  %v1632_v9 = vld [vmem:[%s2118_s1 + $0x38] sm:$0xff]  ;;  %v1474_v14 = vmov 3   ;;  %s206_s11 = scalar_select %p205_p12, %s1454_s19, 1  ;;  %v1475_v15 = vmov 0   ;;  %v1478_v45 = vmov 6  }
  0x19   : > { %vm889_vm0 = vcmask 1041409   ;;  %vm892_vm1 = vcmask 1042434   ;;  %vm895_vm2 = vcmask 1043459   ;;  %vm898_vm3 = vcmask 1044484  }
  0x1a   : > { %s1262_s12 = smul.u32 192, %s206_s11  ;;  %vm901_vm4 = vcmask 1045509   ;;  %vm904_vm5 = vcmask 1046534   ;;  %vm907_vm6 = vcmask 1047559   ;;  %vm910_vm7 = vcmask 130048   ;;  %s1483_s11 = smov 80  }
  0x1b   : > { %vm1039_vm8 = vcmask 64512   ;;  %vm924_vm9 = vcmask 261249   ;;  %vm926_vm10 = vcmask 254080   ;;  %vm940_vm11 = vcmask 392450  }
  0x1c   : > { %293 = vperm.xlu0 %1355, %v1601_v3   ;;  %297 = vperm.xlu1 %1356, %v1606_v4   ;;  %s209_s23 = scalar_lea.vmem %s2117_s0, %s1262_s12  ;;  %s1484_s12 = smov 96   ;;  %vm942_vm12 = vcmask 386304   ;;  %vm956_vm13 = vcmask 523651   ;;  %vm958_vm14 = vcmask 518528   ;;  %vm972_vm15 = vcmask 654852  }
  0x1d   : > { %s1681_s27 = scalar_lea.vmem %s209_s23, %s1228_s24  ;;  %s1485_s23 = smov 112  }
  0x1e   : > { %v1685_v16 = vld [vmem:[%s1681_s27 + $0x18] sm:$0xff]  ;;  %v1690_v20 = vld [vmem:[%s1681_s27 + $0x30] sm:$0xff]  ;;  %v1696_v24 = vld [vmem:[%s1681_s27] sm:$0xff] }
  0x1f   : > { %v1709_v35 = vld [vmem:[%s1681_s27 + $0x60] sm:$0xff]  ;;  %v1726_v44 = vld [vmem:[%s1681_s27 + $0x48] sm:$0xff]  ;;  %v1752_v59 = vld [vmem:[%s1681_s27 + $0x78] sm:$0xff] }
  0x20   : > { %305 = vperm.xlu0 %1355, %v1613_v5   ;;  %301 = vperm.xlu1 %1356, %v1618_v6   ;;  %v1740_v51 = vld [vmem:[%s1681_s27 + $0xa8] sm:$0xff]  ;;  %v1231_v52 = vld [vmem:[%s1681_s27 + $0x1a] sm:$0xff]  ;;  %v1759_v61 = vld [vmem:[%s1681_s27 + $0x90] sm:$0xff] }
  0x24   : > { %309 = vperm.xlu0 %1355, %v1625_v7   ;;  %1357 = vset.pattern.permute.xlu1 %v1469_v8 }
  0x25   : > { %373 = vperm.xlu1 %1357, %v1601_v3  }
  0x28   : > { %313 = vperm.xlu0 %1355, %v1632_v9  }
  0x29   : > { %365 = vperm.xlu1 %1357, %v1594_v1  }
  0x2c   : > { %1358 = vset.pattern.permute.xlu0 %v1469_v8 }
  0x2d   : > { %369 = vperm.xlu0 %1358, %v1589_v0   ;;  %377 = vperm.xlu1 %1357, %v1606_v4  }
  0x31   : > { %381 = vperm.xlu1 %1357, %v1618_v6   ;;  %393 = vperm.xlu0 %1358, %v1632_v9  }
  0x35   : > { %385 = vperm.xlu1 %1357, %v1613_v5   ;;  %1360 = vset.pattern.permute.xlu0 %v1470_v10 }
  0x36   : > { %507 = vperm.xlu0 %1360, %v1589_v0  }
  0x39   : > { %389 = vperm.xlu1 %1357, %v1625_v7  }
  0x3a   : > { %523 = vperm.xlu0 %1360, %v1613_v5  }
  0x3d   : > { %1359 = vset.pattern.permute.xlu1 %v1470_v10 }
  0x3e   : > { %511 = vperm.xlu1 %1359, %v1601_v3   ;;  %527 = vperm.xlu0 %1360, %v1625_v7  }
  0x42   : > { %503 = vperm.xlu1 %1359, %v1594_v1   ;;  %531 = vperm.xlu0 %1360, %v1632_v9  }
  0x46   : > { %515 = vperm.xlu1 %1359, %v1606_v4   ;;  %1362 = vset.pattern.permute.xlu0 %v1471_v11 }
  0x47   : > { %587 = vperm.xlu0 %1362, %v1589_v0  }
  0x4a   : > { %519 = vperm.xlu1 %1359, %v1618_v6  }
  0x4b   : > { %611 = vperm.xlu0 %1362, %v1632_v9  }
  0x4e   : > { %1361 = vset.pattern.permute.xlu1 %v1471_v11 }
  0x4f   : > { %591 = vperm.xlu1 %1361, %v1601_v3   ;;  %1364 = vset.pattern.permute.xlu0 %v1472_v12 }
  0x50   : > { %725 = vperm.xlu0 %1364, %v1589_v0  }
  0x53   : > { %583 = vperm.xlu1 %1361, %v1594_v1  }
  0x54   : > { %741 = vperm.xlu0 %1364, %v1613_v5  }
  0x57   : > { %595 = vperm.xlu1 %1361, %v1606_v4  }
  0x58   : > { %745 = vperm.xlu0 %1364, %v1625_v7  }
  0x5b   : > { %599 = vperm.xlu1 %1361, %v1618_v6  }
  0x5c   : > { %749 = vperm.xlu0 %1364, %v1632_v9  }
  0x5f   : > { %603 = vperm.xlu1 %1361, %v1613_v5  }
  0x60   : > { %1366 = vset.pattern.permute.xlu0 %v1473_v13 }
  0x61   : > { %805 = vperm.xlu0 %1366, %v1589_v0  }
  0x63   : > { %607 = vperm.xlu1 %1361, %v1625_v7  }
  0x65   : > { %825 = vperm.xlu0 %1366, %v1625_v7  }
  0x67   : > { %1363 = vset.pattern.permute.xlu1 %v1472_v12 }
  0x68   : > { %729 = vperm.xlu1 %1363, %v1601_v3  }
  0x69   : > { %1368 = vset.pattern.permute.xlu0 %v1474_v14 }
  0x6a   : > { %459 = vperm.xlu0 %1368, %v1589_v0  }
  0x6c   : > { %721 = vperm.xlu1 %1363, %v1594_v1  }
  0x70   : > { %733 = vperm.xlu1 %1363, %v1606_v4  }
  0x74   : > { %737 = vperm.xlu1 %1363, %v1618_v6  }
  0x78   : > { %1365 = vset.pattern.permute.xlu1 %v1473_v13 }
  0x79   : > { %809 = vperm.xlu1 %1365, %v1601_v3  }
  0x7d   : > { %801 = vperm.xlu1 %1365, %v1594_v1  }
  0x81   : > { %813 = vperm.xlu1 %1365, %v1606_v4  }
  0x85   : > { %817 = vperm.xlu1 %1365, %v1618_v6  }
  0x89   : > { %821 = vperm.xlu1 %1365, %v1613_v5  }
  0x8d   : > { %829 = vperm.xlu1 %1365, %v1632_v9  }
  0x91   : > { %1367 = vset.pattern.permute.xlu1 %v1475_v15 }
  0x92   : > { %235 = vperm.xlu1 %1367, %v1589_v0  }
  0x93   : > { %v290_v17 = vpop.permute.xlu0 %289  ;;  %v286_v18 = vpop.permute.xlu1 %285 }
  0x94   : > { %v317_v19 = vmul.f32 %v290_v17, %v1685_v16  ;;  %v316_v27 = vmul.f32 %v286_v18, %v1696_v24 }
  0x96   : > { %230 = vperm.xlu1 %1367, %v1594_v1   ;;  %334 = vrot.lane.b32.xlu0 %v317_v19, %s1476_s30 }
  0x97   : > { %v294_v21 = vpop.permute.xlu0 %293  ;;  %v298_v22 = vpop.permute.xlu1 %297 }
  0x98   : > { %v318_v23 = vmul.f32 %v294_v21, %v1690_v20  ;;  %v319_v46 = vmul.f32 %v298_v22, %v1726_v44  ;;  %v1782_v21 = vld [vmem:[%s1681_s27 + $0x62] sm:$0xff] }
  0x9a   : > { %245 = vperm.xlu1 %1367, %v1606_v4   ;;  %336 = vrot.lane.b32.xlu0 %v318_v23, %s1476_s30 }
  0x9b   : > { %v306_v25 = vpop.permute.xlu0 %305  ;;  %v302_v26 = vpop.permute.xlu1 %301 }
  0x9c   : > { %v320_v37 = vmul.f32 %v302_v26, %v1709_v35  ;;  %v321_v62 = vmul.f32 %v306_v25, %v1752_v59 }
  0x9e   : > { %255 = vperm.xlu1 %1367, %v1613_v5   ;;  %332 = vrot.lane.b32.xlu0 %v316_v27, %s1476_s30 }
  0x9f   : > { %v1703_v28 = vpop.permute.xlu0 %309 }
  0xa0   : > { %v374_v29 = vpop.permute.xlu1 %373  ;;  %v322_v12 = vmul.f32 %v1703_v28, %v1759_v61 }
  0xa1   : > { %v398_v53 = vmul.f32 %v374_v29, %v1690_v20 }
  0xa2   : > { %260 = vperm.xlu1 %1367, %v1625_v7  }
  0xa3   : > { %v314_v30 = vpop.permute.xlu0 %313 }
  0xa4   : > { %v366_v31 = vpop.permute.xlu1 %365  ;;  %v323_v54 = vmul.f32 %v314_v30, %v1740_v51  ;;  %v1798_v30 = vld [vmem:[%s1681_s27 + $0x32] sm:$0xff] }
  0xa5   : > { %v396_v42 = vmul.f32 %v366_v31, %v1696_v24 }
  0xa6   : > { %1369 = vset.pattern.permute.xlu1 %v1474_v14 }
  0xa7   : > { %463 = vperm.xlu1 %1369, %v1601_v3  }
  0xa8   : > { %v370_v32 = vpop.permute.xlu0 %369  ;;  %v378_v33 = vpop.permute.xlu1 %377 }
  0xa9   : > { %v397_v34 = vmul.f32 %v370_v32, %v1685_v16  ;;  %v399_v8 = vmul.f32 %v378_v33, %v1726_v44 }
  0xab   : > { %455 = vperm.xlu1 %1369, %v1594_v1   ;;  %414 = vrot.lane.b32.xlu0 %v397_v34, %s1477_s5 }
  0xac   : > { %v382_v36 = vpop.permute.xlu1 %381  ;;  %v1714_v38 = vpop.permute.xlu0 %393 }
  0xad   : > { %v400_v19 = vmul.f32 %v382_v36, %v1709_v35  ;;  %v403_v36 = vmul.f32 %v1714_v38, %v1740_v51 }
  0xaf   : > { %467 = vperm.xlu1 %1369, %v1606_v4   ;;  %340 = vrot.lane.b32.xlu0 %v320_v37, %s1476_s30  ;;  %v1812_v37 = vld [vmem:[%s1681_s27 + $0x4a] sm:$0xff] }
  0xb0   : > { %v1718_v39 = vpop.permute.xlu1 %385 }
  0xb1   : > { %v508_v40 = vpop.permute.xlu0 %507  ;;  %v401_v27 = vmul.f32 %v1718_v39, %v1752_v59 }
  0xb2   : > { %v535_v56 = vmul.f32 %v1231_v52, %v508_v40 }
  0xb3   : > { %471 = vperm.xlu1 %1369, %v1618_v6   ;;  %483 = vperm.xlu0 %1368, %v1632_v9  }
  0xb4   : > { %v390_v41 = vpop.permute.xlu1 %389 }
  0xb5   : > { %v1723_v43 = vpop.permute.xlu0 %523  ;;  %v402_v63 = vmul.f32 %v390_v41, %v1759_v61  ;;  %v1820_v41 = vld [vmem:[%s1681_s27 + $0x92] sm:$0xff] }
  0xb7   : > { %475 = vperm.xlu1 %1369, %v1613_v5   ;;  %412 = vrot.lane.b32.xlu0 %v396_v42, %s1477_s5  ;;  %v1827_v42 = vld [vmem:[%s1681_s27 + $0xaa] sm:$0xff] }
  0xb8   : > { %1371 = vset.pattern.permute.xlu0 %v1478_v45 }
  0xb9   : > { %v1731_v47 = vpop.permute.xlu1 %511  ;;  %v1733_v48 = vpop.permute.xlu0 %527 }
  0xba   : > { %v540_v38 = vmul.f32 %v1820_v41, %v1733_v48 }
  0xbb   : > { %338 = vrot.lane.b32.xlu1 %v319_v46, %s1476_s30  ;;  %681 = vperm.xlu0 %1371, %v1601_v3   ;;  %v1833_v46 = vld [vmem:[%s1681_s27 + $0x1c] sm:$0xff] }
  0xbd   : > { %v504_v49 = vpop.permute.xlu1 %503  ;;  %v1737_v50 = vpop.permute.xlu0 %531 }
  0xbf   : > { %479 = vperm.xlu1 %1369, %v1625_v7   ;;  %673 = vperm.xlu0 %1371, %v1594_v1  }
  0xc1   : > { %v1747_v55 = vpop.permute.xlu1 %515 }
  0xc2   : > { %v588_v57 = vpop.permute.xlu0 %587 }
  0xc3   : > { %416 = vrot.lane.b32.xlu1 %v398_v53, %s1477_s5  ;;  %346 = vrot.lane.b32.xlu0 %v323_v54, %s1476_s30  ;;  %v615_v17 = vmul.f32 %v1231_v52, %v588_v57  ;;  %v1847_v53 = vld [vmem:[%s1681_s27 + $0x34] sm:$0xff] }
  0xc4   : > { %1370 = vset.pattern.permute.xlu1 %v1478_v45 }
  0xc5   : > { %v520_v58 = vpop.permute.xlu1 %519 }
  0xc6   : > { %v1756_v60 = vpop.permute.xlu0 %611  ;;  %v538_v23 = vmul.f32 %v1782_v21, %v520_v58 }
  0xc7   : > { %677 = vperm.xlu1 %1370, %v1589_v0   ;;  %552 = vrot.lane.b32.xlu0 %v535_v56, %s1476_s30  ;;  %v1767_v0 = vld [vmem:[%s1681_s27 + $0x2] sm:$0xff] }
  0xc8   : > { %v534_v13 = vmul.f32 %v1767_v0, %v504_v49  ;;  %v541_v49 = vmul.f32 %v1827_v42, %v1737_v50  ;;  %v1854_v56 = vld [vmem:[%s1681_s27 + $0x4] sm:$0xff] }
  0xca   : > { %v592_v1 = vpop.permute.xlu1 %591 }
  0xcb   : > { %342 = vrot.lane.b32.xlu1 %v321_v62, %s1476_s30  ;;  %424 = vrot.lane.b32.xlu0 %v402_v63, %s1477_s5  ;;  %v726_v2 = vpop.permute.xlu0 %725  ;;  %v616_v45 = vmul.f32 %v1798_v30, %v592_v1 }
  0xcc   : > { %v753_v48 = vmul.f32 %v1833_v46, %v726_v2 }
  0xce   : > { %v584_v10 = vpop.permute.xlu1 %583 }
  0xcf   : > { %418 = vrot.lane.b32.xlu1 %v399_v8, %s1477_s5  ;;  %693 = vperm.xlu0 %1371, %v1613_v5   ;;  %v1771_v11 = vpop.permute.xlu0 %741  ;;  %v614_v40 = vmul.f32 %v1767_v0, %v584_v10 }
  0xd2   : > { %v596_v14 = vpop.permute.xlu1 %595 }
  0xd3   : > { %344 = vrot.lane.b32.xlu1 %v322_v12, %s1476_s30  ;;  %550 = vrot.lane.b32.xlu0 %v534_v13, %s1476_s30  ;;  %v1778_v18 = vpop.permute.xlu0 %745  ;;  %v617_v50 = vmul.f32 %v1812_v37, %v596_v14  ;;  %v621_v12 = vmul.f32 %v1827_v42, %v1756_v60 }
  0xd6   : > { %v600_v5 = vpop.permute.xlu1 %599 }
  0xd7   : > { %420 = vrot.lane.b32.xlu1 %v400_v19, %s1477_s5  ;;  %632 = vrot.lane.b32.xlu0 %v615_v17, %s1477_s5  ;;  %v1786_v22 = vpop.permute.xlu0 %749  ;;  %v1875_v17 = vld [vmem:[%s1681_s27 + $0x4c] sm:$0xff] }
  0xda   : > { %v604_v25 = vpop.permute.xlu1 %603 }
  0xdb   : > { %685 = vperm.xlu1 %1370, %v1606_v4   ;;  %558 = vrot.lane.b32.xlu0 %v538_v23, %s1476_s30  ;;  %v536_v4 = vmul.f32 %v1798_v30, %v1731_v47  ;;  %v1836_v47 = vld [vmem:[%s1681_s27 + $0x7a] sm:$0xff] }
  0xdc   : > { %v806_v26 = vpop.permute.xlu0 %805  ;;  %v619_v63 = vmul.f32 %v1836_v47, %v604_v25  ;;  %v1880_v23 = vld [vmem:[%s1681_s27 + $0x94] sm:$0xff] }
  0xdd   : > { %v833_v58 = vmul.f32 %v1833_v46, %v806_v26 }
  0xde   : > { %v608_v28 = vpop.permute.xlu1 %607 }
  0xdf   : > { %422 = vrot.lane.b32.xlu1 %v401_v27, %s1477_s5  ;;  %701 = vperm.xlu0 %1371, %v1632_v9   ;;  %v620_v8 = vmul.f32 %v1820_v41, %v608_v28  ;;  %v1886_v27 = vld [vmem:[%s1681_s27 + $0x64] sm:$0xff]  ;;  %v758_v28 = vmul.f32 %v1880_v23, %v1778_v18 }
  0xe0   : > { %v1795_v29 = vpop.permute.xlu0 %825 }
  0xe3   : > { %v730_v31 = vpop.permute.xlu1 %729  ;;  %689 = vperm.xlu1 %1370, %v1618_v6   ;;  %1372 = vset.pattern.permute.xlu0 %v1475_v15 }
  0xe4   : > { %240 = vperm.xlu0 %1372, %v1601_v3   ;;  %v537_v3 = vmul.f32 %v1812_v37, %v1747_v55  ;;  %v754_v55 = vmul.f32 %v1847_v53, %v730_v31 }
  0xe5   : > { %v460_v32 = vpop.permute.xlu0 %459 }
  0xe6   : > { %v1805_v33 = vmul.f32 %v1231_v52, %v460_v32 }
  0xe7   : > { %v722_v34 = vpop.permute.xlu1 %721  ;;  %554 = vrot.lane.b32.xlu1 %v536_v4, %s1476_s30 }
  0xe8   : > { %250 = vperm.xlu0 %1372, %v1618_v6  }
  0xeb   : > { %v734_v39 = vpop.permute.xlu1 %733  ;;  %426 = vrot.lane.b32.xlu1 %v403_v36, %s1477_s5 }
  0xec   : > { %265 = vperm.xlu0 %1372, %v1632_v9   ;;  %v755_v60 = vmul.f32 %v1875_v17, %v734_v39 }
  0xef   : > { %v738_v6 = vpop.permute.xlu1 %737  ;;  %556 = vrot.lane.b32.xlu1 %v537_v3, %s1476_s30  ;;  %v1901_v3 = vld [vmem:[%s1681_s27 + $0x7c] sm:$0xff] }
  0xf0   : > { %630 = vrot.lane.b32.xlu0 %v614_v40, %s1477_s5  ;;  %v756_v32 = vmul.f32 %v1886_v27, %v738_v6  ;;  %v757_v18 = vmul.f32 %v1901_v3, %v1771_v11 }
  0xf3   : > { %697 = vperm.xlu1 %1370, %v1625_v7   ;;  %v539_v7 = vmul.f32 %v1836_v47, %v1723_v43  ;;  %v752_v43 = vmul.f32 %v1854_v56, %v722_v34  ;;  %v1895_v34 = vld [vmem:[%s1681_s27 + $0xac] sm:$0xff] }
  0xf4   : > { %v810_v9 = vpop.permute.xlu1 %809  ;;  %562 = vrot.lane.b32.xlu0 %v540_v38, %s1476_s30  ;;  %v759_v39 = vmul.f32 %v1895_v34, %v1786_v22 }
  0xf5   : > { %v834_v10 = vmul.f32 %v1847_v53, %v810_v9 }
  0xf7   : > { %634 = vrot.lane.b32.xlu1 %v616_v45, %s1477_s5 }
  0xf8   : > { %v802_v52 = vpop.permute.xlu1 %801  ;;  %564 = vrot.lane.b32.xlu0 %v541_v49, %s1476_s30  ;;  %1373 = vset.pattern.permute.xlu1 %v1475_v15  ;;  %v618_v15 = vmul.f32 %v1782_v21, %v600_v5 }
  0xf9   : > { %v832_v19 = vmul.f32 %v1854_v56, %v802_v52 }
  0xfb   : > { %560 = vrot.lane.b32.xlu1 %v539_v7, %s1476_s30 }
  0xfc   : > { %v814_v54 = vpop.permute.xlu1 %813  ;;  %770 = vrot.lane.b32.xlu0 %v753_v48, %s1476_s30 }
  0xfd   : > { %v835_v6 = vmul.f32 %v1875_v17, %v814_v54 }
  0xff   : > { %636 = vrot.lane.b32.xlu1 %v617_v50, %s1477_s5 }
 0x100   : > { %v818_v57 = vpop.permute.xlu1 %817  ;;  %772 = vrot.lane.b32.xlu0 %v754_v55, %s1476_s30 }
 0x103   : > { %638 = vrot.lane.b32.xlu1 %v618_v15, %s1477_s5 }
 0x104   : > { %v822_v62 = vpop.permute.xlu1 %821  ;;  %768 = vrot.lane.b32.xlu0 %v752_v43, %s1476_s30 }
 0x105   : > { %v837_v11 = vmul.f32 %v1901_v3, %v822_v62 }
 0x107   : > { %640 = vrot.lane.b32.xlu1 %v619_v63, %s1477_s5 }
 0x108   : > { %v830_v1 = vpop.permute.xlu1 %829  ;;  %v335_v2 = vpop.permute.xlu0 %334  ;;  %850 = vrot.lane.b32.xlu0 %v833_v58, %s1477_s5 }
 0x109   : > { %v839_v52 = vmul.f32 %v1895_v34, %v830_v1 }
 0x10b   : > { %642 = vrot.lane.b32.xlu1 %v620_v8, %s1477_s5 }
 0x10c   : > { %852 = vrot.lane.b32.xlu0 %v834_v10, %s1477_s5  ;;  %v1872_v13 = vpop.permute.xlu0 %336 }
 0x10d   : > { %v236_v14 = vpop.permute.xlu1 %235 }
 0x10e   : > { %v269_v5 = vmul.f32 %v236_v14, %v1685_v16 }
 0x10f   : > { %644 = vrot.lane.b32.xlu1 %v621_v12, %s1477_s5 }
 0x110   : > { %848 = vrot.lane.b32.xlu0 %v832_v19, %s1477_s5  ;;  %v357_v25 = vadd.f32 %v335_v2, %v269_v5  ;;  %v333_v4 = vpop.permute.xlu0 %332 }
 0x111   : > { %v231_v26 = vpop.permute.xlu1 %230 }
 0x112   : > { %v268_v31 = vmul.f32 %v231_v26, %v1696_v24  ;;  %v838_v24 = vmul.f32 %v1880_v23, %v1795_v29  ;;  %v836_v29 = vmul.f32 %v1886_v27, %v818_v57 }
 0x113   : > { %774 = vrot.lane.b32.xlu1 %v755_v60, %s1476_s30 }
 0x114   : > { %780 = vrot.lane.b32.xlu0 %v758_v28, %s1476_s30  ;;  %v356_v16 = vadd.f32 %v333_v4, %v268_v31 }
 0x115   : > { %v246_v36 = vpop.permute.xlu1 %245 }
 0x116   : > { %v271_v58 = vmul.f32 %v246_v36, %v1726_v44 }
 0x117   : > { %776 = vrot.lane.b32.xlu1 %v756_v32, %s1476_s30 }
 0x118   : > { %782 = vrot.lane.b32.xlu0 %v759_v39, %s1476_s30 }
 0x119   : > { %v256_v40 = vpop.permute.xlu1 %255 }
 0x11a   : > { %v273_v60 = vmul.f32 %v256_v40, %v1752_v59 }
 0x11b   : > { %778 = vrot.lane.b32.xlu1 %v757_v18, %s1476_s30 }
 0x11c   : > { %860 = vrot.lane.b32.xlu0 %v838_v24, %s1477_s5 }
 0x11d   : > { %v261_v22 = vpop.permute.xlu1 %260  ;;  %v415_v38 = vpop.permute.xlu0 %414 }
 0x11e   : > { %v437_v9 = vadd.f32 %v415_v38, %v357_v25  ;;  %v274_v32 = vmul.f32 %v261_v22, %v1759_v61 }
 0x11f   : > { %854 = vrot.lane.b32.xlu1 %v835_v6, %s1477_s5 }
 0x120   : > { %v495_v45 = vadd.f32 %v1805_v33, %v437_v9 }
 0x121   : > { %v341_v7 = vpop.permute.xlu0 %340 }
 0x122   : > { %v464_v49 = vpop.permute.xlu1 %463 }
 0x123   : > { %856 = vrot.lane.b32.xlu1 %v836_v29, %s1477_s5 }
 0x126   : > { %v456_v48 = vpop.permute.xlu1 %455 }
 0x127   : > { %858 = vrot.lane.b32.xlu1 %v837_v11, %s1477_s5  ;;  %v486_v57 = vmul.f32 %v1767_v0, %v456_v48 }
 0x12a   : > { %v468_v54 = vpop.permute.xlu1 %467 }
 0x12b   : > { %862 = vrot.lane.b32.xlu1 %v839_v52, %s1477_s5  ;;  %v489_v44 = vmul.f32 %v1812_v37, %v468_v54  ;;  %s1486_s5 = smov [#allocation3]  }
 0x12e   : > { %v472_v50 = vpop.permute.xlu1 %471  ;;  %v1919_v55 = vpop.permute.xlu0 %483 }
 0x132   : > { %v476_v33 = vpop.permute.xlu1 %475  ;;  %v413_v15 = vpop.permute.xlu0 %412 }
 0x133   : > { %v436_v43 = vadd.f32 %v413_v15, %v356_v16  ;;  %v491_v22 = vmul.f32 %v1836_v47, %v476_v33  ;;  %v490_v33 = vmul.f32 %v1782_v21, %v472_v50 }
 0x135   : > { %v494_v62 = vadd.f32 %v486_v57, %v436_v43 }
 0x136   : > { %v339_v63 = vpop.permute.xlu1 %338  ;;  %v1923_v2 = vpop.permute.xlu0 %681 }
 0x137   : > { %v359_v8 = vadd.f32 %v339_v63, %v271_v58 }
 0x13a   : > { %v480_v1 = vpop.permute.xlu1 %479  ;;  %v674_v10 = vpop.permute.xlu0 %673 }
 0x13b   : > { %v492_v6 = vmul.f32 %v1820_v41, %v480_v1 }
 0x13e   : > { %v417_v12 = vpop.permute.xlu1 %416  ;;  %v347_v14 = vpop.permute.xlu0 %346 }
 0x142   : > { %v678_v19 = vpop.permute.xlu1 %677  ;;  %v553_v5 = vpop.permute.xlu0 %552 }
 0x143   : > { %v575_v25 = vadd.f32 %v553_v5, %v495_v45  ;;  %v705_v40 = vmul.f32 %v1833_v46, %v678_v19 }
 0x146   : > { %v343_v26 = vpop.permute.xlu1 %342  ;;  %v425_v28 = vpop.permute.xlu0 %424 }
 0x147   : > { %v361_v0 = vadd.f32 %v343_v26, %v273_v60 }
 0x14a   : > { %v419_v31 = vpop.permute.xlu1 %418  ;;  %v1926_v4 = vpop.permute.xlu0 %693 }
 0x14b   : > { %v439_v16 = vadd.f32 %v419_v31, %v359_v8  ;;  %v488_v8 = vmul.f32 %v1798_v30, %v464_v49  ;;  %v493_v30 = vmul.f32 %v1827_v42, %v1919_v55 }
 0x14d   : > { %v497_v36 = vadd.f32 %v489_v44, %v439_v16 }
 0x14e   : > { %v345_v39 = vpop.permute.xlu1 %344  ;;  %v551_v24 = vpop.permute.xlu0 %550 }
 0x14f   : > { %v362_v18 = vadd.f32 %v345_v39, %v274_v32 }
 0x151   : > { %v442_v38 = vadd.f32 %v425_v28, %v362_v18 }
 0x152   : > { %v421_v9 = vpop.permute.xlu1 %420  ;;  %v633_v59 = vpop.permute.xlu0 %632 }
 0x153   : > { %v655_v45 = vadd.f32 %v633_v59, %v575_v25  ;;  %v1932_v29 = vadd.f32 %v492_v6, %v442_v38 }
 0x155   : > { %v713_v11 = vadd.f32 %v705_v40, %v655_v45 }
 0x156   : > { %v686_v48 = vpop.permute.xlu1 %685  ;;  %v1934_v37 = vpop.permute.xlu0 %558 }
 0x157   : > { %v707_v18 = vmul.f32 %v1875_v17, %v686_v48 }
 0x15a   : > { %v423_v52 = vpop.permute.xlu1 %422  ;;  %v1936_v61 = vpop.permute.xlu0 %701 }
 0x15b   : > { %v441_v54 = vadd.f32 %v423_v52, %v361_v0  ;;  %v574_v0 = vadd.f32 %v551_v24, %v494_v62 }
 0x15d   : > { %v499_v15 = vadd.f32 %v491_v22, %v441_v54 }
 0x15e   : > { %v1939_v41 = vpop.permute.xlu1 %689 }
 0x15f   : > { %v241_v57 = vpop.permute.xlu0 %240 }
 0x160   : > { %v270_v43 = vmul.f32 %v241_v57, %v1690_v20 }
 0x162   : > { %v358_v46 = vadd.f32 %v1872_v13, %v270_v43  ;;  %v555_v58 = vpop.permute.xlu1 %554 }
 0x163   : > { %v251_v63 = vpop.permute.xlu0 %250 }
 0x164   : > { %v438_v1 = vadd.f32 %v417_v12, %v358_v46  ;;  %v272_v19 = vmul.f32 %v251_v63, %v1709_v35  ;;  %v704_v35 = vmul.f32 %v1854_v56, %v674_v10 }
 0x166   : > { %v496_v5 = vadd.f32 %v488_v8, %v438_v1  ;;  %v360_v25 = vadd.f32 %v341_v7, %v272_v19  ;;  %v427_v60 = vpop.permute.xlu1 %426 }
 0x167   : > { %v266_v47 = vpop.permute.xlu0 %265 }
 0x168   : > { %v440_v26 = vadd.f32 %v421_v9, %v360_v25  ;;  %v275_v28 = vmul.f32 %v266_v47, %v1740_v51  ;;  %v576_v51 = vadd.f32 %v555_v58, %v496_v5 }
 0x16a   : > { %v363_v20 = vadd.f32 %v347_v14, %v275_v28  ;;  %v557_v31 = vpop.permute.xlu1 %556  ;;  %v1947_v13 = vadd.f32 %v490_v33, %v440_v26  ;;  %v706_v14 = vmul.f32 %v1847_v53, %v1923_v2  ;;  %v709_v53 = vmul.f32 %v1901_v3, %v1926_v4 }
 0x16b   : > { %v631_v44 = vpop.permute.xlu0 %630  ;;  %v577_v56 = vadd.f32 %v557_v31, %v497_v36 }
 0x16c   : > { %v654_v49 = vadd.f32 %v631_v44, %v574_v0  ;;  %v443_v7 = vadd.f32 %v427_v60, %v363_v20 }
 0x16e   : > { %v1952_v12 = vpop.permute.xlu1 %697  ;;  %v1954_v16 = vadd.f32 %v493_v30, %v443_v7  ;;  %v712_v21 = vadd.f32 %v704_v35, %v654_v49  ;;  %v578_v7 = vadd.f32 %v1934_v37, %v1947_v13 }
 0x16f   : > { %v563_v50 = vpop.permute.xlu0 %562 }
 0x172   : > { %v635_v62 = vpop.permute.xlu1 %634 }
 0x173   : > { %v656_v32 = vadd.f32 %v635_v62, %v576_v51  ;;  %v1958_v39 = vpop.permute.xlu0 %564 }
 0x175   : > { %v714_v24 = vadd.f32 %v706_v14, %v656_v32 }
 0x176   : > { %v561_v42 = vpop.permute.xlu1 %560 }
 0x177   : > { %v771_v55 = vpop.permute.xlu0 %770  ;;  %v579_v45 = vadd.f32 %v561_v42, %v499_v15 }
 0x178   : > { %v793_v54 = vadd.f32 %v771_v55, %v713_v11  ;;  %v710_v55 = vmul.f32 %v1880_v23, %v1952_v12 }
 0x17a   : > { %v637_v10 = vpop.permute.xlu1 %636 }
 0x17b   : > { %v657_v6 = vadd.f32 %v637_v10, %v577_v56  ;;  %v773_v38 = vpop.permute.xlu0 %772 }
 0x17c   : > { %v794_v43 = vadd.f32 %v773_v38, %v714_v24  ;;  %v708_v24 = vmul.f32 %v1886_v27, %v1939_v41 }
 0x17d   : > { %v715_v9 = vadd.f32 %v707_v18, %v657_v6  ;;  %v581_v6 = vadd.f32 %v1958_v39, %v1954_v16 }
 0x17e   : > { %v639_v59 = vpop.permute.xlu1 %638 }
 0x17f   : > { %v769_v40 = vpop.permute.xlu0 %768  ;;  %v658_v62 = vadd.f32 %v639_v59, %v578_v7 }
 0x180   : > { %v792_v48 = vadd.f32 %v769_v40, %v712_v21  ;;  %v580_v21 = vadd.f32 %v563_v50, %v1932_v29  ;;  %v711_v50 = vmul.f32 %v1895_v34, %v1936_v61 }
 0x181   : > { %v716_v10 = vadd.f32 %v708_v24, %v658_v62 }
 0x182   : > { %v641_v52 = vpop.permute.xlu1 %640 }
 0x183   : > { %v659_v2 = vadd.f32 %v641_v52, %v579_v45  ;;  %v851_v22 = vpop.permute.xlu0 %850 }
 0x184   : > { %v873_v36 = vadd.f32 %v851_v22, %v793_v54 }
 0x185   : > { %v1963_v57 = vadd.f32 %v709_v53, %v659_v2 }
 0x186   : > { %v643_v46 = vpop.permute.xlu1 %642  ;;  %v888_v63 = vrot.slane %v873_v36, 7 }
 0x187   : > { %v853_v58 = vpop.permute.xlu0 %852  ;;  %v660_v14 = vadd.f32 %v643_v46, %v580_v21 }
 0x188   : > { %v874_v17 = vadd.f32 %v853_v58, %v794_v43 }
 0x189   : > { %v718_v37 = vadd.f32 %v710_v55, %v660_v14  ;;  %v1024_v55 = vld [vmem:[%s2119_s2] sm:$0xff] }
 0x18a   : > { %v891_v8 = vrot.slane %v874_v17, 6  ;;  %v645_v1 = vpop.permute.xlu1 %644  ;;  %1259 = vmatprep.mubr.msk.f32.mxu0 %vm1039_vm8, %v1024_v55 }
 0x18b   : > { %v849_v15 = vpop.permute.xlu0 %848  ;;  %v661_v38 = vadd.f32 %v645_v1, %v581_v6 }
 0x18c   : > { %v1965_v3 = vadd.f32 %v849_v15, %v792_v48  ;;  %v1008_v4 = vsel %vm889_vm0, %v891_v8, %v888_v63 }
 0x18d   : > { %v719_v2 = vadd.f32 %v711_v50, %v661_v38 }
 0x18e   : > { %v775_v11 = vpop.permute.xlu1 %774  ;;  %v912_v19 = vsel %vm892_vm1, %v888_v63, %v1965_v3  ;;  %v928_v5 = vsel %vm895_vm2, %v888_v63, %v1965_v3  ;;  %v944_v25 = vsel %vm898_vm3, %v888_v63, %v1965_v3  ;;  %v960_v60 = vsel %vm901_vm4, %v888_v63, %v1965_v3 }
 0x18f   : > { %v913_v47 = vsel %vm895_vm2, %v891_v8, %v912_v19  ;;  %v929_v33 = vsel %vm898_vm3, %v891_v8, %v928_v5  ;;  %v945_v26 = vsel %vm901_vm4, %v891_v8, %v944_v25  ;;  %v961_v28 = vsel %vm904_vm5, %v891_v8, %v960_v60  ;;  %v781_v30 = vpop.permute.xlu0 %780 }
 0x190   : > { %v976_v0 = vsel %vm904_vm5, %v888_v63, %v1965_v3  ;;  %v1984_v20 = vsel %vm907_vm6, %v888_v63, %v1965_v3  ;;  %v890_v44 = vsel %vm889_vm0, %v888_v63, %v1965_v3  ;;  %v795_v42 = vadd.f32 %v775_v11, %v715_v9 }
 0x191   : > { %v1987_v31 = vsel %vm907_vm6, %v891_v8, %v976_v0  ;;  %v893_v49 = vsel %vm892_vm1, %v891_v8, %v890_v44  ;;  %v798_v59 = vadd.f32 %v781_v30, %v718_v37 }
 0x192   : > { %v777_v35 = vpop.permute.xlu1 %776 }
 0x193   : > { %v783_v32 = vpop.permute.xlu0 %782  ;;  %v796_v13 = vadd.f32 %v777_v35, %v716_v10 }
 0x196   : > { %v779_v51 = vpop.permute.xlu1 %778 }
 0x197   : > { %v861_v40 = vpop.permute.xlu0 %860  ;;  %v797_v34 = vadd.f32 %v779_v51, %v1963_v57  ;;  %v799_v57 = vadd.f32 %v783_v32, %v719_v2 }
 0x198   : > { %v878_v61 = vadd.f32 %v861_v40, %v798_v59 }
 0x19a   : > { %v855_v56 = vpop.permute.xlu1 %854 }
 0x19b   : > { %v875_v18 = vadd.f32 %v855_v56, %v795_v42  ;;  %v1027_v56 = vld [vmem:[%s2120_s3] sm:$0xff] }
 0x19d   : > { %v894_v29 = vrot.slane %v875_v18, 5 }
 0x19e   : > { %v857_v27 = vpop.permute.xlu1 %856 }
 0x19f   : > { %v876_v41 = vadd.f32 %v857_v27, %v796_v13  ;;  %v914_v9 = vsel %vm898_vm3, %v894_v29, %v913_v47  ;;  %v930_v23 = vsel %vm901_vm4, %v894_v29, %v929_v33  ;;  %v946_v12 = vsel %vm904_vm5, %v894_v29, %v945_v26 }
 0x1a0   : > { %v962_v45 = vsel %vm907_vm6, %v894_v29, %v961_v28  ;;  %v993_v16 = vsel %vm889_vm0, %v894_v29, %v891_v8  ;;  %v1009_v39 = vsel %vm892_vm1, %v894_v29, %v1008_v4  ;;  %v896_v52 = vsel %vm895_vm2, %v894_v29, %v893_v49 }
 0x1a1   : > { %v897_v53 = vrot.slane %v876_v41, 4  ;;  %v903_v8 = vrot.slane %v878_v61, 2 }
 0x1a2   : > { %v859_v22 = vpop.permute.xlu1 %858 }
 0x1a3   : > { %v877_v54 = vadd.f32 %v859_v22, %v797_v34  ;;  %v915_v43 = vsel %vm901_vm4, %v897_v53, %v914_v9  ;;  %v931_v36 = vsel %vm904_vm5, %v897_v53, %v930_v23  ;;  %v947_v46 = vsel %vm907_vm6, %v897_v53, %v946_v12  ;;  %v1025_v23 = vld [vmem:[%s2119_s2 + $0x8] sm:$0xff] }
 0x1a4   : > { %v978_v58 = vsel %vm889_vm0, %v897_v53, %v894_v29  ;;  %v994_v17 = vsel %vm892_vm1, %v897_v53, %v993_v16  ;;  %v1010_v48 = vsel %vm895_vm2, %v897_v53, %v1009_v39  ;;  %v899_v63 = vsel %vm898_vm3, %v897_v53, %v896_v52 }
 0x1a5   : > { %v900_v1 = vrot.slane %v877_v54, 3 }
 0x1a6   : > { %v863_v15 = vpop.permute.xlu1 %862 }
 0x1a7   : > { %v879_v4 = vadd.f32 %v863_v15, %v799_v57  ;;  %v916_v11 = vsel %vm904_vm5, %v900_v1, %v915_v43  ;;  %v932_v19 = vsel %vm907_vm6, %v900_v1, %v931_v36  ;;  %v948_v5 = vsel %vm889_vm0, %v903_v8, %v900_v1 }
 0x1a8   : > { %v917_v25 = vsel %vm907_vm6, %v903_v8, %v916_v11  ;;  %v963_v60 = vsel %vm889_vm0, %v900_v1, %v897_v53  ;;  %v979_v47 = vsel %vm892_vm1, %v900_v1, %v978_v58  ;;  %v995_v33 = vsel %vm895_vm2, %v900_v1, %v994_v17 }
 0x1a9   : > { %v906_v26 = vrot.slane %v879_v4, 1  ;;  %918 = vrot.lane.b32.xlu0 %v917_v25, %s1479_s6  ;;  %v964_v28 = vsel %vm892_vm1, %v903_v8, %v963_v60  ;;  %v980_v0 = vsel %vm895_vm2, %v903_v8, %v979_v47  ;;  %v996_v44 = vsel %vm898_vm3, %v903_v8, %v995_v33 }
 0x1aa   : > { %v1011_v30 = vsel %vm898_vm3, %v900_v1, %v1010_v48  ;;  %v902_v35 = vsel %vm901_vm4, %v900_v1, %v899_v63 }
 0x1ab   : > { %920 = vrot.lane.b32.xlu1 %v906_v26, %s1479_s6  ;;  %v933_v49 = vsel %vm889_vm0, %v906_v26, %v903_v8  ;;  %v949_v7 = vsel %vm892_vm1, %v906_v26, %v948_v5  ;;  %v965_v21 = vsel %vm895_vm2, %v906_v26, %v964_v28  ;;  %v981_v51 = vsel %vm898_vm3, %v906_v26, %v980_v0  ;;  %s1378_s6 = sshll.u32 %s1486_s5, 4  ;;  %s1379_s6 = int_to_ptr.vmem [resolvable:$false] %s1378_s6 }
 0x1ac   : > { %v997_v62 = vsel %vm901_vm4, %v906_v26, %v996_v44  ;;  %v1012_v14 = vsel %vm901_vm4, %v903_v8, %v1011_v30  ;;  %v905_v32 = vsel %vm904_vm5, %v903_v8, %v902_v35  ;;  %vm974_vm0 = vcmask 650752  }
 0x1ad   : > { %934 = vrot.lane.b32.xlu0 %v932_v19, %s1480_s8  ;;  %v1013_v24 = vsel %vm904_vm5, %v906_v26, %v1012_v14  ;;  %v908_v42 = vsel %vm907_vm6, %v906_v26, %v905_v32  ;;  %vm988_vm1 = vcmask 786053   ;;  %vm990_vm2 = vcmask 782976  }
 0x1ae   : > { %911 = vst.msk [vmem:[#allocation2] sm:$0xff] %vm910_vm7, %v908_v42  ;;  %vm1004_vm3 = vcmask 917254   ;;  %vm1006_vm4 = vcmask 915200   ;;  %vm1020_vm5 = vcmask 1048455   ;;  %vm1022_vm6 = vcmask 1047424  }
 0x1af   : > { %936 = vrot.lane.b32.xlu1 %v933_v49, %s1480_s8  ;;  %s1380_s8 = scalar_lea.vmem %s1379_s6, 512 }
 0x1b1   : > { %950 = vrot.lane.b32.xlu0 %v947_v46, %s1481_s9 }
 0x1b3   : > { %952 = vrot.lane.b32.xlu1 %v949_v7, %s1481_s9  ;;  %s202_s9 = sand.u32 1, %s1442_s16  }
 0x1b5   : > { %966 = vrot.lane.b32.xlu0 %v962_v45, %s1482_s10 }
 0x1b7   : > { %968 = vrot.lane.b32.xlu1 %v965_v21, %s1482_s10  ;;  %s1226_s10 = sshll.u32 %s202_s9, 4 }
 0x1b8   : > { %s204_s13 = scalar_lea.vmem [#allocation3], %s1226_s10 }
 0x1b9   : > { %982 = vrot.lane.b32.xlu0 %v1987_v31, %s1483_s11  ;;  %s1138_s14 = sshll.u32 %s204_s13, 4  ;;  %s2059_s14 = int_to_ptr.vmem [resolvable:$true] %s1138_s14 }
 0x1ba   : > { %s1374_s30 = scalar_lea.vmem %s2059_s14, 256  ;;  %p1381_p2 = scmp.lt.s32.totalorder %s2059_s14, %s1379_s6 }
 0x1bb   : > { %984 = vrot.lane.b32.xlu1 %v981_v51, %s1483_s11  ;;  %s1250_s11 = sshll.u32 %s1454_s19, 2  ;;  %s2066_s19 = scalar_lea.sflag [#allocation4], %s202_s9 }
 0x1bc   : > { %p1375_p13 = scmp.ne.s32.totalorder %s2059_s14, %s1374_s30  ;;  %p1382_p4 = scmp.lt.s32.totalorder %s1380_s8, %s1374_s30 }
 0x1bd   : > { %998 = vrot.lane.b32.xlu0 %v1984_v20, %s1484_s12  ;;  %v1028_v20 = vld [vmem:[%s2120_s3 + $0x8] sm:$0xff] }
 0x1be   : > { %p1376_p0 = pnand %p1375_p13, %p1566_p3  ;;  %p1383_p5 = por %p1382_p4, %p1381_p2 }
 0x1bf   : > { %1000 = vrot.lane.b32.xlu1 %v997_v62, %s1484_s12  ;;  %s1135_s12 = sadd.s32 %s1450_s18, %s1250_s11 }
 0x1c0   : > { %p1377_p1 = pneg %p1376_p0 }
 0x1c1   : > { %1014 = vrot.lane.b32.xlu0 %v1965_v3, %s1485_s23 }
 0x1c2   : > { %p1384_p6 = pnand %p1383_p5, %p1377_p1 }
 0x1c3   : > { %1016 = vrot.lane.b32.xlu1 %v1013_v24, %s1485_s23  ;;  %s1251_s23 = sshll.u32 %s1135_s12, 7 }
 0x1c4   : > { %s2064_s18 = scalar_lea.hbm %s2121_s4, %s1251_s23 }
 0x1c5   : > { %1031 = vperm.xlu0 %1372, %v1027_v56  }
 0x1c7   : > { %1036 = vperm.xlu1 %1373, %v1028_v20  }
 0x21b   : > { %v919_v31 = vpop.permute.xlu0 %918 }
 0x21c   : > { %925 = vst.msk [vmem:[#allocation2 - $0x1] sm:$0xfe] %vm924_vm9, %v919_v31 }
 0x21d   : > { %v921_v10 = vpop.permute.xlu1 %920 }
 0x21e   : > { %927 = vst.msk [vmem:[#allocation2 + $0x7] sm:$0x1] %vm926_vm10, %v921_v10 }
 0x21f   : > { %v935_v18 = vpop.permute.xlu0 %934 }
 0x220   : > { %941 = vst.msk [vmem:[#allocation2 - $0x2] sm:$0xfc] %vm940_vm11, %v935_v18 }
 0x221   : > { %v937_v3 = vpop.permute.xlu1 %936 }
 0x222   : > { %943 = vst.msk [vmem:[#allocation2 + $0x6] sm:$0x3] %vm942_vm12, %v937_v3 }
 0x223   : > { %v951_v6 = vpop.permute.xlu0 %950 }
 0x224   : > { %957 = vst.msk [vmem:[#allocation2 - $0x3] sm:$0xf8] %vm956_vm13, %v951_v6 }
 0x225   : > { %v953_v37 = vpop.permute.xlu1 %952 }
 0x226   : > { %959 = vst.msk [vmem:[#allocation2 + $0x5] sm:$0x7] %vm958_vm14, %v953_v37 }
 0x227   : > { %v967_v13 = vpop.permute.xlu0 %966 }
 0x228   : > { %973 = vst.msk [vmem:[#allocation2 - $0x4] sm:$0xf0] %vm972_vm15, %v967_v13 }
 0x229   : > { %v969_v29 = vpop.permute.xlu1 %968 }
 0x22a   : > { %975 = vst.msk [vmem:[#allocation2 + $0x4] sm:$0xf] %vm974_vm0, %v969_v29 }
 0x22b   : > { %v983_v50 = vpop.permute.xlu0 %982 }
 0x22c   : > { %989 = vst.msk [vmem:[#allocation2 - $0x5] sm:$0xe0] %vm988_vm1, %v983_v50 }
 0x22d   : > { %v985_v38 = vpop.permute.xlu1 %984 }
 0x22e   : > { %991 = vst.msk [vmem:[#allocation2 + $0x3] sm:$0x1f] %vm990_vm2, %v985_v38 }
 0x22f   : > { %v999_v59 = vpop.permute.xlu0 %998 }
 0x230   : > { %1005 = vst.msk [vmem:[#allocation2 - $0x6] sm:$0xc0] %vm1004_vm3, %v999_v59 }
 0x231   : > { %v1001_v40 = vpop.permute.xlu1 %1000 }
 0x232   : > { %1007 = vst.msk [vmem:[#allocation2 + $0x2] sm:$0x3f] %vm1006_vm4, %v1001_v40 }
 0x233   : > { %v1015_v27 = vpop.permute.xlu0 %1014 }
 0x234   : > { %1021 = vst.msk [vmem:[#allocation2 - $0x7] sm:$0x80] %vm1020_vm5, %v1015_v27 }
 0x235   : > { %v1017_v41 = vpop.permute.xlu1 %1016 }
 0x236   : > { %1023 = vst.msk [vmem:[#allocation2 + $0x1] sm:$0x7f] %vm1022_vm6, %v1017_v41 }
 0x23d   : > { %v1026_v9 = vld [vmem:[#allocation2] sm:$0xff] }
 0x23e   : > { %1257 = vmatprep.subr.mxu0 %v1026_v9 }
 0x23f   : > { %1258 = vmatpush3.msra.mxu0 %v1026_v9 }
 0x240   : > { %1260 = vmatmul.mubr.msk.f32.vlgmr.msra.gmra.mxu0 %vm1039_vm8, %v1025_v23  ;;  %v1032_v39 = vpop.permute.xlu0 %1031 }
 0x242   : > { %v1037_v12 = vpop.permute.xlu1 %1036 }
 0x300   : > { %v1261_v45 = vpop.f32.mrf.mxu0 }
 0x301   : > { %v1118_v16 = vadd.f32 %v1261_v45, %v1037_v12 }
 0x302   : > { %v1112_v52 = vpop.f32.mrf.mxu0 }
 0x303   : > { %1122 = vst [vmem:[%s204_s13 + $0x8] sm:$0xff] %v1118_v16  ;;  %v1113_v34 = vadd.f32 %v1112_v52, %v1032_v39 }
 0x305   : > { %1121 = vst [vmem:[%s204_s13] sm:$0xff] %v1113_v34 }
 0x306   : > { %1387 = shalt.err (!%p1384_p6)
}
 0x307   : > { %s1388_s9 = scalar_lea.hbm %s2064_s18, 256  ;;  %s1392_s12 = scalar_lea.hbm %s2121_s4, 1024 }
 0x308   : > { %p1389_p7 = scmp.ne.s32.totalorder %s2064_s18, %s1388_s9  ;;  %p1393_p11 = scmp.lt.s32.totalorder %s2064_s18, %s2121_s4 }
 0x309   : > { %p1394_p12 = scmp.lt.s32.totalorder %s1392_s12, %s1388_s9 }
 0x30a   : > { %p1390_p9 = pnand %p1389_p7, %p1566_p3 }
 0x30b   : > { %p1395_p13 = por %p1394_p12, %p1393_p11 }
 0x30c   : > { %p1391_p10 = pneg %p1390_p9 }
 0x30e   : > { %p1396_p0 = pnand %p1395_p13, %p1391_p10 }
 0x310   : > { %1399 = shalt.err (!%p1396_p0)
}
 0x311   : > { %s1487_s24 = smov 128   ;;  %s1488_s27 = smov 256  }
 0x312   : > { %s1489_s30 = smov 8  }
 0x313   : > { %1263 = dma.vmem_to_hbm [thread:$0]  (%p1566_p3), %s2059_s14, 256, %s2064_s18, %s2066_s19, %s1487_s24, %s1488_s27, %s1489_s30  }
 0x314 PF: > { %p1269_p1 = scmp.ge.s32.totalorder %s1466_s22, 2  ;;  %s1153_s5 = sand.u32 1, %s1438_s15  }
 0x315   : > { %s1154_s6 = scalar_lea.sflag [#allocation4], %s1153_s5 }
 0x316   : > { %p1266_p2 = pnand %p1269_p1, %p1575_p8 }
 0x318   : > { %p1267_p4 = pneg %p1266_p2 }
 0x31a   : > { %1433 = dma.done.wait (%p1267_p4), %s1154_s6, 256  }
 0x31b   : > { %1435 = vsyncadd (%p1267_p4), %s1154_s6, 4294967040  ;;  %s17_s22 = sadd.s32 1, %s1466_s22   ;;  %s2124_s15 = smov %s1442_s16 }
 0x31c   : > { %p14_p5 = scmp.ge.s32.totalorder %s17_s22, 6   ;;  %s2125_s16 = smov %s1446_s17 }
 0x31d   : > { %s2126_s17 = smov %s1584_s7  ;;  %s2127_s18 = smov %s1458_s20 }
 0x31e   : > { %s2128_s19 = smov %s1462_s21  ;;  %s2129_s20 = smov %s2132_s25 }
 0x31f   : > { %s2130_s21 = smov %s2136_s26  ;;  %16 = sbr.rel (!%p14_p5) target bundleno = 5 (0x5), region = 74 }
 0x324   :  { %1159 = vsyncpa [#allocation4], 1 }
 0x325   :  { %1161 = vsyncpa [#allocation4 + $0x1], 1 }

</bundles_post_ra>
